<compile_context>
chip_gen: v7x
topology: tpu7x:2x2x1
jax: 0.10.0
libtpu: 0.0.40
codegen_flags: <defaults>
</compile_context>

<pallas_src>
import functools

import jax
import jax.numpy as jnp
from jax.experimental import pallas as pl
from jax.experimental.pallas import tpu as pltpu


def _ru(x, m):
    return (x + m - 1) // m * m


def _ce_kernel(x_ref, tgt_ref, out_ref, *, n_rows, n_classes, epsilon):
    i = pl.program_id(0)

    x = x_ref[...].astype(jnp.float32)                            # (bm, C)
    bm, c = x.shape

    # numerically stable log-sum-exp over the class dim (no padding -> no masking needed)
    row_max = jnp.max(x, axis=-1, keepdims=True)                  # (bm, 1)
    sum_exp = jnp.sum(jnp.exp(x - row_max), axis=-1, keepdims=True)
    lse = row_max + jnp.log(sum_exp)                              # (bm, 1)

    row_sum = jnp.sum(x, axis=-1, keepdims=True)                  # (bm, 1)

    # gather x[n, target[n]] with a single in-register select (no HBM gather)
    col_ids = jax.lax.broadcasted_iota(jnp.int32, (bm, c), 1)
    tgt = tgt_ref[...]                                            # (bm, 1) int32
    x_tgt = jnp.sum(jnp.where(col_ids == tgt, x, 0.0),
                    axis=-1, keepdims=True)                       # (bm, 1)

    nll = lse - x_tgt                                             # -log p[target]
    smooth = lse - row_sum * (1.0 / n_classes)                    # -mean(log p)

    # mask rows past the end of the (possibly ragged) last block with a select, so that
    # undefined data in the out-of-bounds rows can never propagate NaN/Inf.
    row_ids = jax.lax.broadcasted_iota(jnp.int32, (bm, 1), 0) + i * bm
    loss_rows = jnp.where(row_ids < n_rows,
                          (1.0 - epsilon) * nll + epsilon * smooth,
                          0.0)
    out_ref[...] = loss_rows
    # TODO(synk): if bundle dumps show the vector-ALU slot saturated (v7x), offload
    #             sum_exp / row_sum to the idle MXU via (bm,C) @ (C,1) ones matmuls.


def cross_entropy_label_smoothing(x, target, epsilon=0.1, block_rows=None):
    """Label-smoothing cross-entropy.  x: (N, C) logits (f32 or bf16), target: (N,) ids."""
    N, C = x.shape

    if block_rows is None:
        # ~2 MiB f32 working tile per grid step (double-buffered inputs + intermediates
        # stay comfortably inside the explicit 32 MiB scoped-VMEM limit on all gens).
        budget_bytes = 2 * 1024 * 1024
        bm = budget_bytes // (C * 4)
        bm = min(bm, 8192)
    else:
        bm = block_rows
    bm = max(8, (bm // 8) * 8)
    bm = min(bm, _ru(N, 8))
    num_blocks = (N + bm - 1) // bm
    Np = num_blocks * bm

    # Only the tiny target vector is reshaped; the logits are consumed un-padded.
    target2d = target.astype(jnp.int32).reshape(N, 1)

    per_row = pl.pallas_call(
        functools.partial(_ce_kernel, n_rows=N, n_classes=C, epsilon=float(epsilon)),
        out_shape=jax.ShapeDtypeStruct((Np, 1), jnp.float32),
        grid=(num_blocks,),
        in_specs=[pl.BlockSpec((bm, C), lambda i: (i, 0)),
                  pl.BlockSpec((bm, 1), lambda i: (i, 0))],
        out_specs=pl.BlockSpec((bm, 1), lambda i: (i, 0)),
        compiler_params=pltpu.CompilerParams(
            dimension_semantics=("parallel",),
            vmem_limit_bytes=32 * 1024 * 1024),
    )(x, target2d)

    # TODO(synk): for very large vocabularies (C*4*bm*2 > ~24 MiB) add a second
    #             "arbitrary" class-axis grid dim with an online (running-max) logsumexp.
    return jnp.sum(per_row) * (1.0 / N)


def _reference(x, target, epsilon=0.1):
    logp = jax.nn.log_softmax(x.astype(jnp.float32), axis=-1)
    mean = -logp.mean(axis=-1)
    nll = -jnp.take_along_axis(logp, target[:, None], axis=-1)[:, 0]
    return ((1.0 - epsilon) * nll + epsilon * mean).mean()


if __name__ == "__main__":
    key = jax.random.PRNGKey(0)
    k1, k2 = jax.random.split(key)
    # small, deliberately not 8/128-aligned shapes; block_rows=16 forces a ragged last block
    N, C = 50, 96
    x = jax.random.normal(k1, (N, C), jnp.float32) * 3.0
    target = jax.random.randint(k2, (N,), 0, C, jnp.int32)

    loss_fn = jax.jit(functools.partial(cross_entropy_label_smoothing,
                                        epsilon=0.1, block_rows=16))
    loss = jax.block_until_ready(loss_fn(x, target))
    ref = jax.block_until_ready(_reference(x, target, epsilon=0.1))
    assert jnp.allclose(loss, ref, rtol=1e-5, atol=1e-5), (loss, ref)

    # bf16 logits accepted directly (halves HBM traffic), auto tile sizing.
    xb = x.astype(jnp.bfloat16)
    loss_b = jax.block_until_ready(jax.jit(cross_entropy_label_smoothing)(xb, target))
    ref_b = jax.block_until_ready(_reference(xb, target, epsilon=0.1))
    assert jnp.allclose(loss_b, ref_b, rtol=1e-3, atol=1e-3), (loss_b, ref_b)

    print("KERNEL_OK")
</pallas_src>

<mosaic_0001>
module attributes {stable_mosaic.version = 11 : i64} {
  func.func @_ce_kernel(%arg0: i32, %arg1: memref<16x96xf32, #tpu.memory_space<vmem>>, %arg2: memref<16x1xi32, #tpu.memory_space<vmem>>, %arg3: memref<16x1xf32, #tpu.memory_space<vmem>>) attributes {dimension_semantics = [#tpu.dimension_semantics<parallel>], iteration_bounds = array<i64: 4>, scalar_prefetch = 0 : i64, scratch_operands = 0 : i64, tpu.core_type = #tpu.core_type<tc>, window_params = [{transform_indices = @transform_0, window_bounds = array<i64: 16, 96>}, {transform_indices = @transform_1, window_bounds = array<i64: 16, 1>}, {transform_indices = @transform_2, window_bounds = array<i64: 16, 1>}]} {
    %c0 = arith.constant 0 : index
    %c0_0 = arith.constant 0 : index
    %0 = vector.load %arg1[%c0, %c0_0] : memref<16x96xf32, #tpu.memory_space<vmem>>, vector<16x96xf32>
    %cst = arith.constant dense<0xFF800000> : vector<16xf32>
    %1 = vector.multi_reduction <maximumf>, %0, %cst [1] : vector<16x96xf32> to vector<16xf32>
    %2 = vector.shape_cast %1 : vector<16xf32> to vector<16x1xf32>
    %3 = vector.broadcast %2 : vector<16x1xf32> to vector<16x96xf32>
    %4 = arith.subf %0, %3 : vector<16x96xf32>
    %5 = math.exp %4 : vector<16x96xf32>
    %cst_1 = arith.constant dense<0.000000e+00> : vector<16xf32>
    %6 = vector.multi_reduction <add>, %5, %cst_1 [1] : vector<16x96xf32> to vector<16xf32>
    %7 = vector.shape_cast %6 : vector<16xf32> to vector<16x1xf32>
    %8 = math.log %7 : vector<16x1xf32>
    %9 = arith.addf %2, %8 : vector<16x1xf32>
    %cst_2 = arith.constant dense<0.000000e+00> : vector<16xf32>
    %10 = vector.multi_reduction <add>, %0, %cst_2 [1] : vector<16x96xf32> to vector<16xf32>
    %11 = vector.shape_cast %10 : vector<16xf32> to vector<16x1xf32>
    %12 = tpu.iota {dimensions = array<i32: 1>} : vector<16x96xi32>
    %c0_3 = arith.constant 0 : index
    %c0_4 = arith.constant 0 : index
    %13 = vector.load %arg2[%c0_3, %c0_4] : memref<16x1xi32, #tpu.memory_space<vmem>>, vector<16x1xi32>
    %14 = vector.broadcast %13 : vector<16x1xi32> to vector<16x96xi32>
    %15 = arith.cmpi eq, %12, %14 : vector<16x96xi32>
    %cst_5 = arith.constant 0.000000e+00 : f32
    %16 = vector.broadcast %cst_5 : f32 to vector<16x96xf32>
    %17 = arith.select %15, %0, %16 : vector<16x96xi1>, vector<16x96xf32>
    %cst_6 = arith.constant dense<0.000000e+00> : vector<16xf32>
    %18 = vector.multi_reduction <add>, %17, %cst_6 [1] : vector<16x96xf32> to vector<16xf32>
    %19 = vector.shape_cast %18 : vector<16xf32> to vector<16x1xf32>
    %20 = arith.subf %9, %19 : vector<16x1xf32>
    %cst_7 = arith.constant 0.010416667 : f32
    %21 = vector.broadcast %cst_7 : f32 to vector<16x1xf32>
    %22 = arith.mulf %11, %21 : vector<16x1xf32>
    %23 = arith.subf %9, %22 : vector<16x1xf32>
    %24 = tpu.iota {dimensions = array<i32: 0>} : vector<16x1xi32>
    %c16_i32 = arith.constant 16 : i32
    %25 = arith.muli %arg0, %c16_i32 : i32
    %26 = vector.broadcast %25 : i32 to vector<16x1xi32>
    %27 = arith.addi %24, %26 : vector<16x1xi32>
    %c50_i32 = arith.constant 50 : i32
    %28 = vector.broadcast %c50_i32 : i32 to vector<16x1xi32>
    %29 = arith.cmpi slt, %27, %28 : vector<16x1xi32>
    %cst_8 = arith.constant 0.899999976 : f32
    %30 = vector.broadcast %cst_8 : f32 to vector<16x1xf32>
    %31 = arith.mulf %30, %20 : vector<16x1xf32>
    %cst_9 = arith.constant 1.000000e-01 : f32
    %32 = vector.broadcast %cst_9 : f32 to vector<16x1xf32>
    %33 = arith.mulf %32, %23 : vector<16x1xf32>
    %34 = arith.addf %31, %33 : vector<16x1xf32>
    %cst_10 = arith.constant 0.000000e+00 : f32
    %35 = vector.broadcast %cst_10 : f32 to vector<16x1xf32>
    %36 = arith.select %29, %34, %35 : vector<16x1xi1>, vector<16x1xf32>
    %c0_11 = arith.constant 0 : index
    %c0_12 = arith.constant 0 : index
    %37 = vector.load %arg3[%c0_11, %c0_12] : memref<16x1xf32, #tpu.memory_space<vmem>>, vector<16x1xf32>
    tpu.vector_store %arg3[%c0_11, %c0_12], %36 {strides = array<i32>} : memref<16x1xf32, #tpu.memory_space<vmem>>, vector<16x1xf32>,
    return
  }
  func.func @transform_0(%arg0: i32) -> (i32, i32) {
    %c0_i32 = arith.constant 0 : i32
    %c0_i32_0 = arith.constant 0 : i32
    return %arg0, %c0_i32 : i32, i32
  }
  func.func @transform_1(%arg0: i32) -> (i32, i32) {
    %c0_i32 = arith.constant 0 : i32
    %c0_i32_0 = arith.constant 0 : i32
    return %arg0, %c0_i32 : i32, i32
  }
  func.func @transform_2(%arg0: i32) -> (i32, i32) {
    %c0_i32 = arith.constant 0 : i32
    %c0_i32_0 = arith.constant 0 : i32
    return %arg0, %c0_i32 : i32, i32
  }
}

</mosaic_0001>

<bundles_post_ra>
// kernel: cross_entropy_label_smoothing.1
= control target key start
LH: loop header
LB: loop body
LE: loop exit
PB: predicated region body
PF: predicated region fallthrough
CT: control target
= control target key end

     0   :  { %s413_s9 = smov 0   ;;  %s451_s0 = inlined_call_operand.vmem [shape: f32[50,96], index: 0, kind: input, shape index: {}]   ;;  %s452_s1 = inlined_call_operand.vmem [shape: s32[50,1], index: 1, kind: input, shape index: {}]   ;;  %s453_s2 = inlined_call_operand.vmem [shape: f32[64,1], index: 2, kind: output, shape index: {}]  }
   0x1 LB: > { %s356_s10 = sadd.s32 4294967295, %s395_s9   ;;  %p360_p0 = scmp.ge.s32.totalorder %s395_s9, 1  ;;  %s395_s9 = sphi %s413_s9, %s12_s9  }
   0x2   : > { %p140_p1 = scmp.lt.s32.totalorder %s395_s9, 5 }
   0x4   : > { %p141_p2 = pnand %p360_p0, %p140_p1 }
   0x5   : > { %s423_s11 = sshll.u32 (!%p141_p2), %s356_s10, 1  ;;  %v397_v0 = vmov (!%p141_p2), 0   ;;  %vm211_vm0 = vcmask (!%p141_p2), 785408   ;;  %v242_v13 = vlaneseq (!%p141_p2)  ;;  %s367_s20 = sshll.u32 (!%p141_p2), %s356_s10, 4  ;;  %vm285_vm4 = vcmask (!%p141_p2), 7168  }
   0x6   : > { %144 = sbr.rel (%p141_p2) target bundleno = 346 (0x15a), region = 28  ;;  %p180_p3 = scmp.lt.s32.totalorder (!%p141_p2), %s423_s11, 6  ;;  %379 = vset.pattern.permute.xlu1 (!%p141_p2), %v397_v0  ;;  %380 = vset.pattern.permute.xlu0 (!%p141_p2), %v397_v0  ;;  %v272_v34 = vstv (!%p141_p2), %s367_s20 }
   0x7   : > { %v243_v17 = vand.u32 (!%p141_p2), 127, %v242_v13  ;;  %p204_p4 = scmp.lt.s32.totalorder (!%p141_p2), %s423_s11, 7  ;;  %v269_v32 = vshrl.u32 (!%p141_p2), %v242_v13, 7 }
   0x9   : > { %v273_v39 = vadd.s32 (!%p141_p2), %v272_v34, %v269_v32  ;;  %v270_v40 = vadd.s32 (!%p141_p2), 8, %v269_v32 }
   0xb   : > { %vm275_vm3 = vcmp.lt.s32.totalorder (!%p141_p2), %v273_v39, 50  ;;  %v274_v48 = vadd.s32 (!%p141_p2), %v272_v34, %v270_v40 }
   0xd   : > { %s181_s12 = scalar_select %p180_p3, %s423_s11, 6  ;;  %vm276_vm5 = vcmp.lt.s32.totalorder %v274_v48, 50 }
   0xe   : > { %s455_s11 = smov (!%p204_p4, %s423_s11), 7 }
   0xf   : > { %s362_s13 = sshll.u32 %s181_s12, 3  ;;  %s366_s21 = sshll.u32 %s455_s11, 3 }
  0x10   : > { %s183_s16 = scalar_lea.vmem %s451_s0, %s362_s13  ;;  %s197_s19 = scalar_lea.vmem %s452_s1, %s362_s13 }
  0x11   : > { %v209_v1 = vld [vmem:[%s183_s16] sm:$0xff]  ;;  %v210_v2 = vld [vmem:[%s183_s16 + $0x8] sm:$0xff]  ;;  %s207_s24 = scalar_lea.vmem %s453_s2, %s366_s21 }
  0x12   : > { %v244_v3 = vld [vmem:[%s197_s19] sm:$0xff]  ;;  %v212_v4 = vsel %vm211_vm0, %v209_v1, -inf  ;;  %v245_v5 = vld [vmem:[%s197_s19 + $0x8] sm:$0xff]  ;;  %v215_v6 = vsel %vm211_vm0, %v210_v2, -inf  ;;  %v236_v18 = vsel %vm211_vm0, %v209_v1, 0.0  ;;  %v239_v22 = vsel %vm211_vm0, %v210_v2, 0.0 }
  0x13   : > { %247 = vperm.xlu1 %379, %v244_v3   ;;  %213 = vmax.xlane.f32.xlu0 %v212_v4 }
  0x17   : > { %250 = vperm.xlu1 %379, %v245_v5   ;;  %216 = vmax.xlane.f32.xlu0 %v215_v6 }
  0x92   : > { %v248_v15 = vpop.permute.xlu1 %247 }
  0x93   : > { %vm252_vm1 = vcmp.eq.s32.totalorder %v243_v17, %v248_v15 }
  0x94   : > { %v254_v23 = vsel %vm252_vm1, %v209_v1, 0.0 }
  0x95   : > { %v256_v24 = vsel %vm211_vm0, %v254_v23, 0.0 }
  0x96   : > { %v251_v21 = vpop.permute.xlu1 %250 }
  0x97   : > { %vm253_vm2 = vcmp.eq.s32.totalorder %v243_v17, %v251_v21 }
  0x98   : > { %v255_v25 = vsel %vm253_vm2, %v210_v2, 0.0 }
  0x99   : > { %v259_v26 = vsel %vm211_vm0, %v255_v25, 0.0 }
  0xa0   : > { %v214_v7 = vpop.xlane.xlu0 %213 }
  0xa1   : > { %v218_v8 = vsub.f32 %v209_v1, %v214_v7 }
  0xa3   : > { %v220_v9 = vmul.f32 1.442695, %v218_v8 }
  0xa4   : > { %v217_v10 = vpop.xlane.xlu0 %216 }
  0xa5   : > { %381 = vpow2.f32 %v220_v9  ;;  %v219_v11 = vsub.f32 %v210_v2, %v217_v10 }
  0xa7   : > { %v222_v12 = vmul.f32 1.442695, %v219_v11 }
  0xa9   : > { %383 = vpow2.f32 %v222_v12 }
  0xaf   : > { %v382_v14 = vpop.eup %381 }
  0xb0   : > { %v224_v16 = vsel %vm211_vm0, %v382_v14, 0.0 }
  0xb1   : > { %225 = vadd.xlane.f32.xlu0 %v224_v16 }
  0xb3   : > { %v384_v19 = vpop.eup %383 }
  0xb4   : > { %v227_v20 = vsel %vm211_vm0, %v384_v19, 0.0 }
  0xb5   : > { %237 = vadd.xlane.f32.xlu0 %v236_v18  ;;  %228 = vadd.xlane.f32.xlu1 %v227_v20 }
  0xb9   : > { %240 = vadd.xlane.f32.xlu0 %v239_v22 }
  0xbd   : > { %257 = vadd.xlane.f32.xlu0 %v256_v24 }
  0xc1   : > { %260 = vadd.xlane.f32.xlu0 %v259_v26 }
 0x13e   : > { %v226_v27 = vpop.xlane.xlu0 %225 }
 0x13f   : > { %385 = vlog2.f32 %v226_v27 }
 0x142   : > { %v229_v28 = vpop.xlane.xlu1 %228  ;;  %v238_v29 = vpop.xlane.xlu0 %237 }
 0x143   : > { %387 = vlog2.f32 %v229_v28  ;;  %v264_v37 = vmul.f32 0.010416667, %v238_v29 }
 0x146   : > { %v241_v30 = vpop.xlane.xlu0 %240 }
 0x147   : > { %v265_v46 = vmul.f32 0.010416667, %v241_v30 }
 0x149   : > { %v386_v31 = vpop.eup %385 }
 0x14a   : > { %v231_v33 = vmul.f32 0.6931472, %v386_v31  ;;  %v258_v35 = vpop.xlane.xlu0 %257 }
 0x14c   : > { %v234_v36 = vadd.f32 %v231_v33, %v214_v7 }
 0x14d   : > { %v388_v38 = vpop.eup %387 }
 0x14e   : > { %v233_v41 = vmul.f32 0.6931472, %v388_v38  ;;  %v266_v42 = vsub.f32 %v234_v36, %v264_v37  ;;  %v262_v43 = vsub.f32 %v234_v36, %v258_v35  ;;  %v261_v49 = vpop.xlane.xlu0 %260 }
 0x150   : > { %v279_v44 = vmul.f32 0.1, %v266_v42  ;;  %v235_v45 = vadd.f32 %v233_v41, %v217_v10  ;;  %v277_v47 = vmul.f32 0.9, %v262_v43 }
 0x152   : > { %v267_v50 = vsub.f32 %v235_v45, %v265_v46  ;;  %v281_v51 = vadd.f32 %v279_v44, %v277_v47  ;;  %v263_v52 = vsub.f32 %v235_v45, %v261_v49 }
 0x154   : > { %v280_v53 = vmul.f32 0.1, %v267_v50  ;;  %v283_v54 = vsel %vm275_vm3, %v281_v51, 0.0  ;;  %v278_v55 = vmul.f32 0.9, %v263_v52 }
 0x155   : > { %286 = vst.msk [vmem:[%s207_s24] sm:$0xff] %vm285_vm4, %v283_v54 }
 0x156   : > { %v282_v56 = vadd.f32 %v280_v53, %v278_v55 }
 0x158   : > { %v284_v57 = vsel %vm276_vm5, %v282_v56, 0.0 }
 0x159   : > { %287 = vst.msk [vmem:[%s207_s24 + $0x8] sm:$0xff] %vm285_vm4, %v284_v57 }
 0x15a PF: > { %s12_s9 = sadd.s32 1, %s395_s9  }
 0x15b   : > { %p9_p5 = scmp.ge.s32.totalorder %s12_s9, 6  }
 0x15d   :  { %11 = sbr.rel (!%p9_p5) target bundleno = 1 (0x1), region = 61 }

</bundles_post_ra>
